<compile_context>
chip_gen: v7x
topology: tpu7x:2x2x1
jax: 0.10.0
libtpu: 0.0.40
codegen_flags: <defaults>
</compile_context>

<pallas_src>
import functools

import jax
import jax.numpy as jnp
from jax import lax
from jax.experimental import pallas as pl
from jax.experimental.pallas import tpu as pltpu


def _round_up(x, m):
    return (x + m - 1) // m * m


def _resrnn_kernel(x_ref, wih_ref, whh_ref, bias_ref, fcw_ref, fcb_ref,
                   out_ref, gi_ref, h_ref, ht_ref, hs_ref, hn_ref,
                   *, seq, chunk, res_depth):
    """One grid step == one time chunk.

    x_ref   : [chunk, batch_p, in_p]     time-major padded input chunk
    wih_ref : [in_p, hidden_p]           W_i2h^T (zero padded)
    whh_ref : [hidden_p, hidden_p]       W_h2h^T (zero padded)
    bias_ref: [1, hidden_p]              b_i2h + b_h2h (pre-folded)
    fcw_ref : [hidden_p, out_p]          fc W^T
    fcb_ref : [1, out_p]                 fc b
    out_ref : [batch_p, out_p]           fc(last pre-activation hn)
    gi_ref  : VMEM [chunk, batch_p, hidden_p]  staged input projection
    h/ht/hs/hn_ref : VMEM [batch_p, hidden_p]  recurrent state across chunks
    """
    c = pl.program_id(0)
    chunk_t, batch_p, in_p = x_ref.shape
    hidden_p = whh_ref.shape[0]

    # --- First chunk: zero the recurrent state (h0 = zeros, as in PyTorch). ---
    @pl.when(c == 0)
    def _init():
        z = jnp.zeros((batch_p, hidden_p), jnp.float32)
        h_ref[...] = z
        ht_ref[...] = z
        hs_ref[...] = z
        hn_ref[...] = z

    # --- (1) Input projection for the WHOLE chunk as one MXU matmul, folded
    #         bias added once, staged time-major into VMEM scratch so every
    #         recurrence step reads one aligned [batch_p, hidden_p] tile. ---
    x2d = x_ref[...].reshape(chunk_t * batch_p, in_p)       # tile-aligned reshape
    gi = jnp.dot(x2d, wih_ref[...], preferred_element_type=jnp.float32)
    gi = gi + bias_ref[...]
    gi_ref[...] = gi.reshape(chunk_t, batch_p, hidden_p)

    whh = whh_ref[...]        # recurrent weights loaded once per chunk

    # --- (2) Serial recurrence.  Only h @ W_h2h^T + tanh is on the critical
    #         path; residual selection is a few vselects on the step index. ---
    def step(t, carry):
        h, ht, hs, hn_last = carry
        i = c * chunk + t                       # global timestep (scalar)
        gi_t = gi_ref[t]                        # single aligned vld
        hn = gi_t + jnp.dot(h, whh, preferred_element_type=jnp.float32)

        if res_depth == 0:
            h_new, ht_new, hs_new = jnp.tanh(hn), ht, hs
        elif res_depth == 1:
            h_new, ht_new, hs_new = jnp.tanh(hn + h), ht, hs
        elif res_depth >= 2:
            use_res = jnp.logical_and(i % res_depth == 0, i != 0)
            h_new = jnp.tanh(hn + jnp.where(use_res, ht, 0.0))
            ht_new = jnp.where(use_res, hn, ht)
            hs_new = hs
        else:  # res_depth == -1
            hs_new = jnp.where(i == 0, hn, hs)
            is_last2 = i == seq - 2
            is_res = jnp.logical_and(
                jnp.logical_and(i % 4 == 0, i != 0),
                jnp.logical_not(is_last2))
            add = jnp.where(is_last2, hs_new, jnp.where(is_res, ht, 0.0))
            h_new = jnp.tanh(hn + add)
            ht_new = jnp.where(is_res, hn, ht)

        # Padded (i >= seq) trailing steps leave all state untouched.
        valid = i < seq
        return (jnp.where(valid, h_new, h),
                jnp.where(valid, ht_new, ht),
                jnp.where(valid, hs_new, hs),
                jnp.where(valid, hn, hn_last))

    unroll = True if chunk <= 16 else (8 if chunk % 8 == 0 else 1)
    carry0 = (h_ref[...], ht_ref[...], hs_ref[...], hn_ref[...])
    h, ht, hs, hn = lax.fori_loop(0, chunk, step, carry0, unroll=unroll)
    h_ref[...] = h
    ht_ref[...] = ht
    hs_ref[...] = hs
    hn_ref[...] = hn

    # --- (3) fc on the last PRE-ACTIVATION hn (PyTorch: hn.view -> fc).
    #         Written every chunk (tiny matmul); the last chunk's value is the
    #         final lane-dense [batch_p, out_p] output. ---
    out_ref[...] = (jnp.dot(hn, fcw_ref[...], preferred_element_type=jnp.float32)
                    + fcb_ref[...]).astype(out_ref.dtype)


@functools.partial(jax.jit, static_argnames=("res_depth",))
def resrnn_forward(x_bsi, w_i2h, b_i2h, w_h2h, b_h2h, fc_w, fc_b, *, res_depth):
    """x_bsi: [batch, seq, inputDim] (PyTorch layout). Returns [batch, outputDim]."""
    batch, seq, in_dim = x_bsi.shape
    hidden = w_h2h.shape[0]
    out_dim = fc_w.shape[0]
    if seq < 1:
        raise ValueError("seq must be >= 1")
    if res_depth < -1:
        raise ValueError(f"unsupported res_depth={res_depth}")

    # f32 sublane/lane tile alignment: batch -> x8, feature dims -> x128.
    batch_p = _round_up(batch, 8)
    hidden_p = _round_up(hidden, 128)
    in_p = _round_up(in_dim, 128)
    out_p = _round_up(out_dim, 128)

    # Time-chunk grid: each grid step processes `chunk` timesteps; the next
    # chunk's x DMA is pipelined against the current chunk's recurrence.
    chunk = seq if seq <= 256 else 256
    seq_p = _round_up(seq, chunk)
    num_chunks = seq_p // chunk

    f32 = jnp.float32
    # Time-major, zero-padded x: [seq_p, batch_p, in_p].
    # TODO(synk): for very large seq*batch this transpose/pad makes one extra
    # HBM copy of x; it could be folded into the BlockSpec index_map instead.
    x_tm = jnp.transpose(x_bsi.astype(f32), (1, 0, 2))
    x_tm = jnp.pad(x_tm, ((0, seq_p - seq), (0, batch_p - batch),
                          (0, in_p - in_dim)))

    def pad2(a, r, c):
        a = a.astype(f32)
        return jnp.pad(a, ((0, r - a.shape[0]), (0, c - a.shape[1])))

    wih_p = pad2(w_i2h.T, in_p, hidden_p)                       # W_i2h^T
    whh_p = pad2(w_h2h.T, hidden_p, hidden_p)                   # W_h2h^T
    bias_p = pad2((b_i2h + b_h2h).reshape(1, hidden), 1, hidden_p)
    fcw_p = pad2(fc_w.T, hidden_p, out_p)                       # fc W^T
    fcb_p = pad2(fc_b.reshape(1, out_dim), 1, out_p)

    kernel = functools.partial(_resrnn_kernel, seq=seq, chunk=chunk,
                               res_depth=res_depth)

    # Explicit VMEM budget (re-derived so it also fits v7x's 64 MiB per core).
    vmem_bytes = 4 * (
        2 * chunk * batch_p * in_p              # x chunk, double-buffered
        + chunk * batch_p * hidden_p            # gi staging scratch
        + in_p * hidden_p + hidden_p * hidden_p + hidden_p * out_p  # weights
        + 8 * hidden_p + 8 * out_p              # (padded) bias rows
        + 4 * batch_p * hidden_p                # h / ht / hstart / hn scratch
        + 2 * batch_p * out_p)                  # output block
    vmem_limit = min(max(2 * vmem_bytes, 8 * 1024 * 1024), 100 * 1024 * 1024)

    out_padded = pl.pallas_call(
        kernel,
        out_shape=jax.ShapeDtypeStruct((batch_p, out_p), f32),
        grid=(num_chunks,),
        in_specs=[
            pl.BlockSpec((chunk, batch_p, in_p), lambda c: (c, 0, 0)),  # x
            pl.BlockSpec((in_p, hidden_p), lambda c: (0, 0)),           # W_i2h^T
            pl.BlockSpec((hidden_p, hidden_p), lambda c: (0, 0)),       # W_h2h^T
            pl.BlockSpec((1, hidden_p), lambda c: (0, 0)),              # bias
            pl.BlockSpec((hidden_p, out_p), lambda c: (0, 0)),          # fc W^T
            pl.BlockSpec((1, out_p), lambda c: (0, 0)),                 # fc b
        ],
        out_specs=pl.BlockSpec((batch_p, out_p), lambda c: (0, 0)),
        scratch_shapes=[
            pltpu.VMEM((chunk, batch_p, hidden_p), f32),   # gi staging
            pltpu.VMEM((batch_p, hidden_p), f32),          # h
            pltpu.VMEM((batch_p, hidden_p), f32),          # ht
            pltpu.VMEM((batch_p, hidden_p), f32),          # hstart
            pltpu.VMEM((batch_p, hidden_p), f32),          # hn (last pre-act)
        ],
        compiler_params=pltpu.CompilerParams(
            dimension_semantics=("arbitrary",),
            vmem_limit_bytes=vmem_limit),
    )(x_tm, wih_p, whh_p, bias_p, fcw_p, fcb_p)

    return out_padded[:batch, :out_dim]


def resrnn_reference(x_bsi, w_i2h, b_i2h, w_h2h, b_h2h, fc_w, fc_b, res_depth):
    """Pure-JAX replica of ResRNNModel.forward (for validation)."""
    batch, seq, _ = x_bsi.shape
    hidden = w_h2h.shape[0]
    h0 = jnp.zeros((batch, hidden), jnp.float32)
    ht = h0
    hstart = None
    hn = None
    for i in range(seq):
        hn = x_bsi[:, i, :] @ w_i2h.T + b_i2h + h0 @ w_h2h.T + b_h2h
        if res_depth == 0:
            h0 = jnp.tanh(hn)
        if res_depth == 1:
            h0 = jnp.tanh(hn + h0)
        if res_depth >= 2:
            if i % res_depth == 0 and i != 0:
                h0 = jnp.tanh(hn + ht)
                ht = hn
            else:
                h0 = jnp.tanh(hn)
        if res_depth == -1:
            if i == 0:
                hstart = hn
            if i == seq - 2:
                h0 = jnp.tanh(hn + hstart)
            elif i % 4 == 0 and i != 0:
                h0 = jnp.tanh(hn + ht)
                ht = hn
            else:
                h0 = jnp.tanh(hn)
    return hn @ fc_w.T + fc_b


if __name__ == "__main__":
    batch, seq = 2, 8
    input_dim, hidden, output_dim = 4, 32, 8

    key = jax.random.PRNGKey(0)
    kx, k1, k2, k3, k4, k5, k6 = jax.random.split(key, 7)

    # Deterministic PyTorch-style uniform(-1/sqrt(H), 1/sqrt(H)) init
    bound = 1.0 / (hidden ** 0.5)
    w_i2h = jax.random.uniform(k1, (hidden, input_dim), jnp.float32, -bound, bound)
    b_i2h = jax.random.uniform(k2, (hidden,), jnp.float32, -bound, bound)
    w_h2h = jax.random.uniform(k3, (hidden, hidden), jnp.float32, -bound, bound)
    b_h2h = jax.random.uniform(k4, (hidden,), jnp.float32, -bound, bound)
    fc_w = jax.random.uniform(k5, (output_dim, hidden), jnp.float32, -bound, bound)
    fc_b = jax.random.uniform(k6, (output_dim,), jnp.float32, -bound, bound)

    x = jax.random.normal(kx, (batch, seq, input_dim), jnp.float32)

    # Validate every resDepth mode of the module against the pure-JAX reference.
    for res_depth in (0, 1, 2, 3, -1):
        out = resrnn_forward(x, w_i2h, b_i2h, w_h2h, b_h2h, fc_w, fc_b,
                             res_depth=res_depth)
        out = jax.block_until_ready(out)
        ref = resrnn_reference(x, w_i2h, b_i2h, w_h2h, b_h2h, fc_w, fc_b, res_depth)
        assert out.shape == (batch, output_dim)
        assert jnp.allclose(out, ref, atol=1e-4, rtol=1e-4), \
            f"mismatch vs reference (res_depth={res_depth})"

    print("KERNEL_OK")
</pallas_src>

<mosaic_0001>
module attributes {stable_mosaic.version = 11 : i64} {
  func.func @_resrnn_kernel(%arg0: i32, %arg1: memref<8x8x128xf32, #tpu.memory_space<vmem>>, %arg2: memref<128x128xf32, #tpu.memory_space<vmem>>, %arg3: memref<128x128xf32, #tpu.memory_space<vmem>>, %arg4: memref<1x128xf32, #tpu.memory_space<vmem>>, %arg5: memref<128x128xf32, #tpu.memory_space<vmem>>, %arg6: memref<1x128xf32, #tpu.memory_space<vmem>>, %arg7: memref<8x128xf32, #tpu.memory_space<vmem>>, %arg8: memref<8x8x128xf32, #tpu.memory_space<vmem>>, %arg9: memref<8x128xf32, #tpu.memory_space<vmem>>, %arg10: memref<8x128xf32, #tpu.memory_space<vmem>>, %arg11: memref<8x128xf32, #tpu.memory_space<vmem>>, %arg12: memref<8x128xf32, #tpu.memory_space<vmem>>) attributes {dimension_semantics = [#tpu.dimension_semantics<arbitrary>], iteration_bounds = array<i64: 1>, scalar_prefetch = 0 : i64, scratch_operands = 5 : i64, tpu.core_type = #tpu.core_type<tc>, window_params = [{transform_indices = @transform_0, window_bounds = array<i64: 8, 8, 128>}, {pipeline_mode = #tpu.pipeline_mode<synchronous>, transform_indices = @transform_1, window_bounds = array<i64: 128, 128>}, {pipeline_mode = #tpu.pipeline_mode<synchronous>, transform_indices = @transform_2, window_bounds = array<i64: 128, 128>}, {pipeline_mode = #tpu.pipeline_mode<synchronous>, transform_indices = @transform_3, window_bounds = array<i64: 1, 128>}, {pipeline_mode = #tpu.pipeline_mode<synchronous>, transform_indices = @transform_4, window_bounds = array<i64: 128, 128>}, {pipeline_mode = #tpu.pipeline_mode<synchronous>, transform_indices = @transform_5, window_bounds = array<i64: 1, 128>}, {pipeline_mode = #tpu.pipeline_mode<synchronous>, transform_indices = @transform_6, window_bounds = array<i64: 8, 128>}]} {
    %c0_i32 = arith.constant 0 : i32
    %0 = arith.cmpi eq, %arg0, %c0_i32 : i32
    %1 = arith.extui %0 : i1 to i32
    %c0_i32_0 = arith.constant 0 : i32
    %2 = arith.cmpi ne, %1, %c0_i32_0 : i32
    scf.if %2 {
      %cst_76 = arith.constant 0.000000e+00 : f32
      %131 = vector.broadcast %cst_76 : f32 to vector<8x128xf32>
      %c0_77 = arith.constant 0 : index
      %c0_78 = arith.constant 0 : index
      %132 = vector.load %arg9[%c0_77, %c0_78] : memref<8x128xf32, #tpu.memory_space<vmem>>, vector<8x128xf32>
      tpu.vector_store %arg9[%c0_77, %c0_78], %131 {strides = array<i32>} : memref<8x128xf32, #tpu.memory_space<vmem>>, vector<8x128xf32>,
      %c0_79 = arith.constant 0 : index
      %c0_80 = arith.constant 0 : index
      %133 = vector.load %arg10[%c0_79, %c0_80] : memref<8x128xf32, #tpu.memory_space<vmem>>, vector<8x128xf32>
      tpu.vector_store %arg10[%c0_79, %c0_80], %131 {strides = array<i32>} : memref<8x128xf32, #tpu.memory_space<vmem>>, vector<8x128xf32>,
      %c0_81 = arith.constant 0 : index
      %c0_82 = arith.constant 0 : index
      %134 = vector.load %arg11[%c0_81, %c0_82] : memref<8x128xf32, #tpu.memory_space<vmem>>, vector<8x128xf32>
      tpu.vector_store %arg11[%c0_81, %c0_82], %131 {strides = array<i32>} : memref<8x128xf32, #tpu.memory_space<vmem>>, vector<8x128xf32>,
      %c0_83 = arith.constant 0 : index
      %c0_84 = arith.constant 0 : index
      %135 = vector.load %arg12[%c0_83, %c0_84] : memref<8x128xf32, #tpu.memory_space<vmem>>, vector<8x128xf32>
      tpu.vector_store %arg12[%c0_83, %c0_84], %131 {strides = array<i32>} : memref<8x128xf32, #tpu.memory_space<vmem>>, vector<8x128xf32>,
    } else {
    }
    %c0 = arith.constant 0 : index
    %c0_1 = arith.constant 0 : index
    %c0_2 = arith.constant 0 : index
    %3 = vector.load %arg1[%c0, %c0_1, %c0_2] : memref<8x8x128xf32, #tpu.memory_space<vmem>>, vector<8x8x128xf32>
    %4 = vector.shape_cast %3 : vector<8x8x128xf32> to vector<64x128xf32>
    %c0_3 = arith.constant 0 : index
    %c0_4 = arith.constant 0 : index
    %5 = vector.load %arg2[%c0_3, %c0_4] : memref<128x128xf32, #tpu.memory_space<vmem>>, vector<128x128xf32>
    %cst = arith.constant dense<0.000000e+00> : vector<64x128xf32>
    %6 = tpu.matmul %4, %5, %cst {dimension_numbers = #tpu.dot_dimension_numbers<[1], [0], [0], [1], [0, 0, 1, 1], [], []>} : vector<64x128xf32>, vector<128x128xf32>, vector<64x128xf32> -> vector<64x128xf32>
    %c0_5 = arith.constant 0 : index
    %c0_6 = arith.constant 0 : index
    %7 = vector.load %arg4[%c0_5, %c0_6] : memref<1x128xf32, #tpu.memory_space<vmem>>, vector<1x128xf32>
    %8 = vector.broadcast %7 : vector<1x128xf32> to vector<64x128xf32>
    %9 = arith.addf %6, %8 : vector<64x128xf32>
    %10 = vector.shape_cast %9 : vector<64x128xf32> to vector<8x8x128xf32>
    %c0_7 = arith.constant 0 : index
    %c0_8 = arith.constant 0 : index
    %c0_9 = arith.constant 0 : index
    %11 = vector.load %arg8[%c0_7, %c0_8, %c0_9] : memref<8x8x128xf32, #tpu.memory_space<vmem>>, vector<8x8x128xf32>
    tpu.vector_store %arg8[%c0_7, %c0_8, %c0_9], %10 {strides = array<i32>} : memref<8x8x128xf32, #tpu.memory_space<vmem>>, vector<8x8x128xf32>,
    %c0_10 = arith.constant 0 : index
    %c0_11 = arith.constant 0 : index
    %12 = vector.load %arg3[%c0_10, %c0_11] : memref<128x128xf32, #tpu.memory_space<vmem>>, vector<128x128xf32>
    %c0_12 = arith.constant 0 : index
    %c0_13 = arith.constant 0 : index
    %13 = vector.load %arg9[%c0_12, %c0_13] : memref<8x128xf32, #tpu.memory_space<vmem>>, vector<8x128xf32>
    %c0_14 = arith.constant 0 : index
    %c0_15 = arith.constant 0 : index
    %14 = vector.load %arg10[%c0_14, %c0_15] : memref<8x128xf32, #tpu.memory_space<vmem>>, vector<8x128xf32>
    %c0_16 = arith.constant 0 : index
    %c0_17 = arith.constant 0 : index
    %15 = vector.load %arg11[%c0_16, %c0_17] : memref<8x128xf32, #tpu.memory_space<vmem>>, vector<8x128xf32>
    %c0_18 = arith.constant 0 : index
    %c0_19 = arith.constant 0 : index
    %16 = vector.load %arg12[%c0_18, %c0_19] : memref<8x128xf32, #tpu.memory_space<vmem>>, vector<8x128xf32>
    %c0_i32_20 = arith.constant 0 : i32
    %c8_i32 = arith.constant 8 : i32
    %17 = arith.muli %arg0, %c8_i32 : i32
    %18 = arith.addi %17, %c0_i32_20 : i32
    %19 = arith.index_cast %c0_i32_20 : i32 to index
    %c0_21 = arith.constant 0 : index
    %c0_22 = arith.constant 0 : index
    %20 = vector.load %arg8[%19, %c0_21, %c0_22] : memref<8x8x128xf32, #tpu.memory_space<vmem>>, vector<1x8x128xf32>
    %21 = vector.shape_cast %20 : vector<1x8x128xf32> to vector<8x128xf32>
    %cst_23 = arith.constant dense<0.000000e+00> : vector<8x128xf32>
    %22 = tpu.matmul %13, %12, %cst_23 {dimension_numbers = #tpu.dot_dimension_numbers<[1], [0], [0], [1], [0, 0, 1, 1], [], []>} : vector<8x128xf32>, vector<128x128xf32>, vector<8x128xf32> -> vector<8x128xf32>
    %23 = arith.addf %21, %22 : vector<8x128xf32>
    %24 = math.tanh %23 : vector<8x128xf32>
    %c8_i32_24 = arith.constant 8 : i32
    %25 = arith.cmpi slt, %18, %c8_i32_24 : i32
    %26 = arith.select %25, %24, %13 : vector<8x128xf32>
    %27 = arith.select %25, %14, %14 : vector<8x128xf32>
    %28 = arith.select %25, %15, %15 : vector<8x128xf32>
    %29 = arith.select %25, %23, %16 : vector<8x128xf32>
    %c1_i32 = arith.constant 1 : i32
    %c8_i32_25 = arith.constant 8 : i32
    %30 = arith.muli %arg0, %c8_i32_25 : i32
    %31 = arith.addi %30, %c1_i32 : i32
    %32 = arith.index_cast %c1_i32 : i32 to index
    %c0_26 = arith.constant 0 : index
    %c0_27 = arith.constant 0 : index
    %33 = vector.load %arg8[%32, %c0_26, %c0_27] : memref<8x8x128xf32, #tpu.memory_space<vmem>>, vector<1x8x128xf32>
    %34 = vector.shape_cast %33 : vector<1x8x128xf32> to vector<8x128xf32>
    %cst_28 = arith.constant dense<0.000000e+00> : vector<8x128xf32>
    %35 = tpu.matmul %26, %12, %cst_28 {dimension_numbers = #tpu.dot_dimension_numbers<[1], [0], [0], [1], [0, 0, 1, 1], [], []>} : vector<8x128xf32>, vector<128x128xf32>, vector<8x128xf32> -> vector<8x128xf32>
    %36 = arith.addf %34, %35 : vector<8x128xf32>
    %37 = math.tanh %36 : vector<8x128xf32>
    %c8_i32_29 = arith.constant 8 : i32
    %38 = arith.cmpi slt, %31, %c8_i32_29 : i32
    %39 = arith.select %38, %37, %26 : vector<8x128xf32>
    %40 = arith.select %38, %27, %27 : vector<8x128xf32>
    %41 = arith.select %38, %28, %28 : vector<8x128xf32>
    %42 = arith.select %38, %36, %29 : vector<8x128xf32>
    %c2_i32 = arith.constant 2 : i32
    %c8_i32_30 = arith.constant 8 : i32
    %43 = arith.muli %arg0, %c8_i32_30 : i32
    %44 = arith.addi %43, %c2_i32 : i32
    %45 = arith.index_cast %c2_i32 : i32 to index
    %c0_31 = arith.constant 0 : index
    %c0_32 = arith.constant 0 : index
    %46 = vector.load %arg8[%45, %c0_31, %c0_32] : memref<8x8x128xf32, #tpu.memory_space<vmem>>, vector<1x8x128xf32>
    %47 = vector.shape_cast %46 : vector<1x8x128xf32> to vector<8x128xf32>
    %cst_33 = arith.constant dense<0.000000e+00> : vector<8x128xf32>
    %48 = tpu.matmul %39, %12, %cst_33 {dimension_numbers = #tpu.dot_dimension_numbers<[1], [0], [0], [1], [0, 0, 1, 1], [], []>} : vector<8x128xf32>, vector<128x128xf32>, vector<8x128xf32> -> vector<8x128xf32>
    %49 = arith.addf %47, %48 : vector<8x128xf32>
    %50 = math.tanh %49 : vector<8x128xf32>
    %c8_i32_34 = arith.constant 8 : i32
    %51 = arith.cmpi slt, %44, %c8_i32_34 : i32
    %52 = arith.select %51, %50, %39 : vector<8x128xf32>
    %53 = arith.select %51, %40, %40 : vector<8x128xf32>
    %54 = arith.select %51, %41, %41 : vector<8x128xf32>
    %55 = arith.select %51, %49, %42 : vector<8x128xf32>
    %c3_i32 = arith.constant 3 : i32
    %c8_i32_35 = arith.constant 8 : i32
    %56 = arith.muli %arg0, %c8_i32_35 : i32
    %57 = arith.addi %56, %c3_i32 : i32
    %58 = arith.index_cast %c3_i32 : i32 to index
    %c0_36 = arith.constant 0 : index
    %c0_37 = arith.constant 0 : index
    %59 = vector.load %arg8[%58, %c0_36, %c0_37] : memref<8x8x128xf32, #tpu.memory_space<vmem>>, vector<1x8x128xf32>
    %60 = vector.shape_cast %59 : vector<1x8x128xf32> to vector<8x128xf32>
    %cst_38 = arith.constant dense<0.000000e+00> : vector<8x128xf32>
    %61 = tpu.matmul %52, %12, %cst_38 {dimension_numbers = #tpu.dot_dimension_numbers<[1], [0], [0], [1], [0, 0, 1, 1], [], []>} : vector<8x128xf32>, vector<128x128xf32>, vector<8x128xf32> -> vector<8x128xf32>
    %62 = arith.addf %60, %61 : vector<8x128xf32>
    %63 = math.tanh %62 : vector<8x128xf32>
    %c8_i32_39 = arith.constant 8 : i32
    %64 = arith.cmpi slt, %57, %c8_i32_39 : i32
    %65 = arith.select %64, %63, %52 : vector<8x128xf32>
    %66 = arith.select %64, %53, %53 : vector<8x128xf32>
    %67 = arith.select %64, %54, %54 : vector<8x128xf32>
    %68 = arith.select %64, %62, %55 : vector<8x128xf32>
    %c4_i32 = arith.constant 4 : i32
    %c8_i32_40 = arith.constant 8 : i32
    %69 = arith.muli %arg0, %c8_i32_40 : i32
    %70 = arith.addi %69, %c4_i32 : i32
    %71 = arith.index_cast %c4_i32 : i32 to index
    %c0_41 = arith.constant 0 : index
    %c0_42 = arith.constant 0 : index
    %72 = vector.load %arg8[%71, %c0_41, %c0_42] : memref<8x8x128xf32, #tpu.memory_space<vmem>>, vector<1x8x128xf32>
    %73 = vector.shape_cast %72 : vector<1x8x128xf32> to vector<8x128xf32>
    %cst_43 = arith.constant dense<0.000000e+00> : vector<8x128xf32>
    %74 = tpu.matmul %65, %12, %cst_43 {dimension_numbers = #tpu.dot_dimension_numbers<[1], [0], [0], [1], [0, 0, 1, 1], [], []>} : vector<8x128xf32>, vector<128x128xf32>, vector<8x128xf32> -> vector<8x128xf32>
    %75 = arith.addf %73, %74 : vector<8x128xf32>
    %76 = math.tanh %75 : vector<8x128xf32>
    %c8_i32_44 = arith.constant 8 : i32
    %77 = arith.cmpi slt, %70, %c8_i32_44 : i32
    %78 = arith.select %77, %76, %65 : vector<8x128xf32>
    %79 = arith.select %77, %66, %66 : vector<8x128xf32>
    %80 = arith.select %77, %67, %67 : vector<8x128xf32>
    %81 = arith.select %77, %75, %68 : vector<8x128xf32>
    %c5_i32 = arith.constant 5 : i32
    %c8_i32_45 = arith.constant 8 : i32
    %82 = arith.muli %arg0, %c8_i32_45 : i32
    %83 = arith.addi %82, %c5_i32 : i32
    %84 = arith.index_cast %c5_i32 : i32 to index
    %c0_46 = arith.constant 0 : index
    %c0_47 = arith.constant 0 : index
    %85 = vector.load %arg8[%84, %c0_46, %c0_47] : memref<8x8x128xf32, #tpu.memory_space<vmem>>, vector<1x8x128xf32>
    %86 = vector.shape_cast %85 : vector<1x8x128xf32> to vector<8x128xf32>
    %cst_48 = arith.constant dense<0.000000e+00> : vector<8x128xf32>
    %87 = tpu.matmul %78, %12, %cst_48 {dimension_numbers = #tpu.dot_dimension_numbers<[1], [0], [0], [1], [0, 0, 1, 1], [], []>} : vector<8x128xf32>, vector<128x128xf32>, vector<8x128xf32> -> vector<8x128xf32>
    %88 = arith.addf %86, %87 : vector<8x128xf32>
    %89 = math.tanh %88 : vector<8x128xf32>
    %c8_i32_49 = arith.constant 8 : i32
    %90 = arith.cmpi slt, %83, %c8_i32_49 : i32
    %91 = arith.select %90, %89, %78 : vector<8x128xf32>
    %92 = arith.select %90, %79, %79 : vector<8x128xf32>
    %93 = arith.select %90, %80, %80 : vector<8x128xf32>
    %94 = arith.select %90, %88, %81 : vector<8x128xf32>
    %c6_i32 = arith.constant 6 : i32
    %c8_i32_50 = arith.constant 8 : i32
    %95 = arith.muli %arg0, %c8_i32_50 : i32
    %96 = arith.addi %95, %c6_i32 : i32
    %97 = arith.index_cast %c6_i32 : i32 to index
    %c0_51 = arith.constant 0 : index
    %c0_52 = arith.constant 0 : index
    %98 = vector.load %arg8[%97, %c0_51, %c0_52] : memref<8x8x128xf32, #tpu.memory_space<vmem>>, vector<1x8x128xf32>
    %99 = vector.shape_cast %98 : vector<1x8x128xf32> to vector<8x128xf32>
    %cst_53 = arith.constant dense<0.000000e+00> : vector<8x128xf32>
    %100 = tpu.matmul %91, %12, %cst_53 {dimension_numbers = #tpu.dot_dimension_numbers<[1], [0], [0], [1], [0, 0, 1, 1], [], []>} : vector<8x128xf32>, vector<128x128xf32>, vector<8x128xf32> -> vector<8x128xf32>
    %101 = arith.addf %99, %100 : vector<8x128xf32>
    %102 = math.tanh %101 : vector<8x128xf32>
    %c8_i32_54 = arith.constant 8 : i32
    %103 = arith.cmpi slt, %96, %c8_i32_54 : i32
    %104 = arith.select %103, %102, %91 : vector<8x128xf32>
    %105 = arith.select %103, %92, %92 : vector<8x128xf32>
    %106 = arith.select %103, %93, %93 : vector<8x128xf32>
    %107 = arith.select %103, %101, %94 : vector<8x128xf32>
    %c7_i32 = arith.constant 7 : i32
    %c8_i32_55 = arith.constant 8 : i32
    %108 = arith.muli %arg0, %c8_i32_55 : i32
    %109 = arith.addi %108, %c7_i32 : i32
    %110 = arith.index_cast %c7_i32 : i32 to index
    %c0_56 = arith.constant 0 : index
    %c0_57 = arith.constant 0 : index
    %111 = vector.load %arg8[%110, %c0_56, %c0_57] : memref<8x8x128xf32, #tpu.memory_space<vmem>>, vector<1x8x128xf32>
    %112 = vector.shape_cast %111 : vector<1x8x128xf32> to vector<8x128xf32>
    %cst_58 = arith.constant dense<0.000000e+00> : vector<8x128xf32>
    %113 = tpu.matmul %104, %12, %cst_58 {dimension_numbers = #tpu.dot_dimension_numbers<[1], [0], [0], [1], [0, 0, 1, 1], [], []>} : vector<8x128xf32>, vector<128x128xf32>, vector<8x128xf32> -> vector<8x128xf32>
    %114 = arith.addf %112, %113 : vector<8x128xf32>
    %115 = math.tanh %114 : vector<8x128xf32>
    %c8_i32_59 = arith.constant 8 : i32
    %116 = arith.cmpi slt, %109, %c8_i32_59 : i32
    %117 = arith.select %116, %115, %104 : vector<8x128xf32>
    %118 = arith.select %116, %105, %105 : vector<8x128xf32>
    %119 = arith.select %116, %106, %106 : vector<8x128xf32>
    %120 = arith.select %116, %114, %107 : vector<8x128xf32>
    %c8_i32_60 = arith.constant 8 : i32
    %c0_61 = arith.constant 0 : index
    %c0_62 = arith.constant 0 : index
    %121 = vector.load %arg9[%c0_61, %c0_62] : memref<8x128xf32, #tpu.memory_space<vmem>>, vector<8x128xf32>
    tpu.vector_store %arg9[%c0_61, %c0_62], %117 {strides = array<i32>} : memref<8x128xf32, #tpu.memory_space<vmem>>, vector<8x128xf32>,
    %c0_63 = arith.constant 0 : index
    %c0_64 = arith.constant 0 : index
    %122 = vector.load %arg10[%c0_63, %c0_64] : memref<8x128xf32, #tpu.memory_space<vmem>>, vector<8x128xf32>
    tpu.vector_store %arg10[%c0_63, %c0_64], %118 {strides = array<i32>} : memref<8x128xf32, #tpu.memory_space<vmem>>, vector<8x128xf32>,
    %c0_65 = arith.constant 0 : index
    %c0_66 = arith.constant 0 : index
    %123 = vector.load %arg11[%c0_65, %c0_66] : memref<8x128xf32, #tpu.memory_space<vmem>>, vector<8x128xf32>
    tpu.vector_store %arg11[%c0_65, %c0_66], %119 {strides = array<i32>} : memref<8x128xf32, #tpu.memory_space<vmem>>, vector<8x128xf32>,
    %c0_67 = arith.constant 0 : index
    %c0_68 = arith.constant 0 : index
    %124 = vector.load %arg12[%c0_67, %c0_68] : memref<8x128xf32, #tpu.memory_space<vmem>>, vector<8x128xf32>
    tpu.vector_store %arg12[%c0_67, %c0_68], %120 {strides = array<i32>} : memref<8x128xf32, #tpu.memory_space<vmem>>, vector<8x128xf32>,
    %c0_69 = arith.constant 0 : index
    %c0_70 = arith.constant 0 : index
    %125 = vector.load %arg5[%c0_69, %c0_70] : memref<128x128xf32, #tpu.memory_space<vmem>>, vector<128x128xf32>
    %cst_71 = arith.constant dense<0.000000e+00> : vector<8x128xf32>
    %126 = tpu.matmul %120, %125, %cst_71 {dimension_numbers = #tpu.dot_dimension_numbers<[1], [0], [0], [1], [0, 0, 1, 1], [], []>} : vector<8x128xf32>, vector<128x128xf32>, vector<8x128xf32> -> vector<8x128xf32>
    %c0_72 = arith.constant 0 : index
    %c0_73 = arith.constant 0 : index
    %127 = vector.load %arg6[%c0_72, %c0_73] : memref<1x128xf32, #tpu.memory_space<vmem>>, vector<1x128xf32>
    %128 = vector.broadcast %127 : vector<1x128xf32> to vector<8x128xf32>
    %129 = arith.addf %126, %128 : vector<8x128xf32>
    %c0_74 = arith.constant 0 : index
    %c0_75 = arith.constant 0 : index
    %130 = vector.load %arg7[%c0_74, %c0_75] : memref<8x128xf32, #tpu.memory_space<vmem>>, vector<8x128xf32>
    tpu.vector_store %arg7[%c0_74, %c0_75], %129 {strides = array<i32>} : memref<8x128xf32, #tpu.memory_space<vmem>>, vector<8x128xf32>,
    return
  }
  func.func @transform_0(%arg0: i32) -> (i32, i32, i32) {
    %c0_i32 = arith.constant 0 : i32
    %c0_i32_0 = arith.constant 0 : i32
    %c0_i32_1 = arith.constant 0 : i32
    return %arg0, %c0_i32, %c0_i32_0 : i32, i32, i32
  }
  func.func @transform_1(%arg0: i32) -> (i32, i32) {
    %c0_i32 = arith.constant 0 : i32
    %c0_i32_0 = arith.constant 0 : i32
    %c0_i32_1 = arith.constant 0 : i32
    return %c0_i32, %c0_i32_0 : i32, i32
  }
  func.func @transform_2(%arg0: i32) -> (i32, i32) {
    %c0_i32 = arith.constant 0 : i32
    %c0_i32_0 = arith.constant 0 : i32
    %c0_i32_1 = arith.constant 0 : i32
    return %c0_i32, %c0_i32_0 : i32, i32
  }
  func.func @transform_3(%arg0: i32) -> (i32, i32) {
    %c0_i32 = arith.constant 0 : i32
    %c0_i32_0 = arith.constant 0 : i32
    %c0_i32_1 = arith.constant 0 : i32
    return %c0_i32, %c0_i32_0 : i32, i32
  }
  func.func @transform_4(%arg0: i32) -> (i32, i32) {
    %c0_i32 = arith.constant 0 : i32
    %c0_i32_0 = arith.constant 0 : i32
    %c0_i32_1 = arith.constant 0 : i32
    return %c0_i32, %c0_i32_0 : i32, i32
  }
  func.func @transform_5(%arg0: i32) -> (i32, i32) {
    %c0_i32 = arith.constant 0 : i32
    %c0_i32_0 = arith.constant 0 : i32
    %c0_i32_1 = arith.constant 0 : i32
    return %c0_i32, %c0_i32_0 : i32, i32
  }
  func.func @transform_6(%arg0: i32) -> (i32, i32) {
    %c0_i32 = arith.constant 0 : i32
    %c0_i32_0 = arith.constant 0 : i32
    %c0_i32_1 = arith.constant 0 : i32
    return %c0_i32, %c0_i32_0 : i32, i32
  }
}

</mosaic_0001>

<bundles_post_ra>
// kernel: resrnn_forward.1
= control target key start
LH: loop header
LB: loop body
LE: loop exit
PB: predicated region body
PF: predicated region fallthrough
CT: control target
= control target key end

     0   :  { %v1747_v2 = vmov 0.0|0.0   ;;  %vm1748_vm0 = vmmov 0   ;;  %v1749_v4 = vmov 0.0   ;;  %s2155_s1 = inlined_call_operand.vmem [shape: f32[128,128], index: 1, kind: input, shape index: {}]   ;;  %s2156_s2 = inlined_call_operand.vmem [shape: f32[128,128], index: 2, kind: input, shape index: {}]   ;;  %s2157_s0 = inlined_call_operand.vmem [shape: f32[8,8,128], index: 0, kind: input, shape index: {}]   ;;  %s2158_s3 = inlined_call_operand.vmem [shape: f32[1,128], index: 3, kind: input, shape index: {}]   ;;  %s2159_s4 = inlined_call_operand.vmem [shape: f32[128,128], index: 4, kind: input, shape index: {}]   ;;  %s2160_s5 = inlined_call_operand.vmem [shape: f32[1,128], index: 5, kind: input, shape index: {}]   ;;  %s2161_s6 = inlined_call_operand.vmem [shape: f32[8,128], index: 6, kind: output, shape index: {}]  }
   0x1   :  { %v39_v0 = vld [vmem:[%s2155_s1] sm:$0xff]  ;;  %v40_v1 = vld [vmem:[%s2155_s1 + $0x8] sm:$0xff]  ;;  %1514 = vmatprep.subr.bf16.mxu1 %v1747_v2  ;;  %1199 = vmatprep.mubr.msk.f32.mxu1 %vm1748_vm0, %v1749_v4  ;;  %v41_v7 = vld [vmem:[%s2155_s1 + $0x10] sm:$0xff] }
   0x2   :  { %v175_v3 = vld [vmem:[%s2156_s2] sm:$0xff]  ;;  %v1482_v5 = vpack.c.bf16 %v40_v1, %v39_v0  ;;  %v176_v6 = vld [vmem:[%s2156_s2 + $0x8] sm:$0xff]  ;;  %v42_v8 = vld [vmem:[%s2155_s1 + $0x18] sm:$0xff] }
   0x3   :  { %v1806_v9 = vpack.c.bf16 %v176_v6, %v175_v3  ;;  %v1486_v10 = vpack.c.bf16 %v42_v8, %v41_v7  ;;  %v177_v11 = vld [vmem:[%s2156_s2 + $0x10] sm:$0xff]  ;;  %v178_v12 = vld [vmem:[%s2156_s2 + $0x18] sm:$0xff]  ;;  %v43_v13 = vld [vmem:[%s2155_s1 + $0x20] sm:$0xff] }
   0x4   :  { %1483 = vmatprep.subr.bf16.mxu0 %v1482_v5  ;;  %v44_v14 = vld [vmem:[%s2155_s1 + $0x28] sm:$0xff]  ;;  %v1821_v15 = vpack.c.bf16 %v178_v12, %v177_v11  ;;  %v179_v17 = vld [vmem:[%s2156_s2 + $0x20] sm:$0xff]  ;;  %v45_v19 = vld [vmem:[%s2155_s1 + $0x30] sm:$0xff] }
   0x5   :  { %1485 = vmatpush3.bf16.msra.mxu0 %v1482_v5  ;;  %1516 = vmatpush3.bf16.msra.mxu1 %v1806_v9  ;;  %v1490_v16 = vpack.c.bf16 %v44_v14, %v43_v13  ;;  %v180_v18 = vld [vmem:[%s2156_s2 + $0x28] sm:$0xff]  ;;  %v46_v20 = vld [vmem:[%s2155_s1 + $0x38] sm:$0xff]  ;;  %v181_v23 = vld [vmem:[%s2156_s2 + $0x30] sm:$0xff] }
   0x6   :  { %1487 = vmatprep.subr.bf16.mxu0 %v1486_v10  ;;  %1517 = vmatprep.subr.bf16.mxu1 %v1747_v2  ;;  %v1837_v21 = vpack.c.bf16 %v180_v18, %v179_v17  ;;  %v1494_v22 = vpack.c.bf16 %v46_v20, %v45_v19  ;;  %v182_v24 = vld [vmem:[%s2156_s2 + $0x38] sm:$0xff]  ;;  %v47_v25 = vld [vmem:[%s2155_s1 + $0x40] sm:$0xff]  ;;  %v48_v26 = vld [vmem:[%s2155_s1 + $0x48] sm:$0xff] }
   0x7   :  { %v31_v27 = vld [vmem:[%s2157_s0] sm:$0xff]  ;;  %v1856_v28 = vpack.c.bf16 %v182_v24, %v181_v23  ;;  %v1498_v29 = vpack.c.bf16 %v48_v26, %v47_v25  ;;  %v184_v31 = vld [vmem:[%s2156_s2 + $0x48] sm:$0xff]  ;;  %v49_v32 = vld [vmem:[%s2155_s1 + $0x50] sm:$0xff] }
   0x8   :  { %1155 = vmatprep.mubr.f32.mxu0 %v31_v27  ;;  %v183_v30 = vld [vmem:[%s2156_s2 + $0x40] sm:$0xff]  ;;  %v50_v33 = vld [vmem:[%s2155_s1 + $0x58] sm:$0xff]  ;;  %v185_v36 = vld [vmem:[%s2156_s2 + $0x50] sm:$0xff] }
   0x9   :  { %1489 = vmatpush3.bf16.msra.mxu0 %v1486_v10  ;;  %1519 = vmatpush3.bf16.msra.mxu1 %v1821_v15  ;;  %v1872_v34 = vpack.c.bf16 %v184_v31, %v183_v30  ;;  %v1502_v35 = vpack.c.bf16 %v50_v33, %v49_v32  ;;  %v186_v37 = vld [vmem:[%s2156_s2 + $0x58] sm:$0xff]  ;;  %v51_v38 = vld [vmem:[%s2155_s1 + $0x60] sm:$0xff]  ;;  %v52_v39 = vld [vmem:[%s2155_s1 + $0x68] sm:$0xff] }
   0xa   :  { %1491 = vmatprep.subr.bf16.mxu0 %v1490_v16  ;;  %1520 = vmatprep.subr.bf16.mxu1 %v1747_v2  ;;  %v1888_v40 = vpack.c.bf16 %v186_v37, %v185_v36  ;;  %v1506_v41 = vpack.c.bf16 %v52_v39, %v51_v38  ;;  %v187_v42 = vld [vmem:[%s2156_s2 + $0x60] sm:$0xff]  ;;  %v188_v43 = vld [vmem:[%s2156_s2 + $0x68] sm:$0xff]  ;;  %v53_v44 = vld [vmem:[%s2155_s1 + $0x70] sm:$0xff] }
   0xb   :  { %v54_v45 = vld [vmem:[%s2155_s1 + $0x78] sm:$0xff]  ;;  %v1904_v46 = vpack.c.bf16 %v188_v43, %v187_v42  ;;  %v189_v48 = vld [vmem:[%s2156_s2 + $0x70] sm:$0xff]  ;;  %v32_v51 = vld [vmem:[%s2157_s0 + $0x8] sm:$0xff] }
   0xc   :  { %v1510_v47 = vpack.c.bf16 %v54_v45, %v53_v44  ;;  %v190_v49 = vld [vmem:[%s2156_s2 + $0x78] sm:$0xff]  ;;  %v33_v52 = vld [vmem:[%s2157_s0 + $0x10] sm:$0xff]  ;;  %v35_v54 = vld [vmem:[%s2157_s0 + $0x20] sm:$0xff] }
   0xd   :  { %1493 = vmatpush3.bf16.msra.mxu0 %v1490_v16  ;;  %1522 = vmatpush3.bf16.msra.mxu1 %v1837_v21  ;;  %v1914_v50 = vpack.c.bf16 %v190_v49, %v189_v48  ;;  %v34_v53 = vld [vmem:[%s2157_s0 + $0x18] sm:$0xff]  ;;  %v36_v55 = vld [vmem:[%s2157_s0 + $0x28] sm:$0xff]  ;;  %v37_v56 = vld [vmem:[%s2157_s0 + $0x30] sm:$0xff] }
   0xe   :  { %1495 = vmatprep.subr.bf16.mxu0 %v1494_v22  ;;  %1523 = vmatprep.subr.bf16.mxu1 %v1747_v2  ;;  %v38_v57 = vld [vmem:[%s2157_s0 + $0x38] sm:$0xff]  ;;  %v1981_v58 = vld [vmem:[%s2158_s3] ss:$0 sm:$0xff]  ;;  %v847_v36 = vld [vmem:[%s2159_s4 + $0x8] sm:$0xff] }
   0xf   :  { %v848_v37 = vld [vmem:[%s2159_s4 + $0x10] sm:$0xff]  ;;  %v849_v39 = vld [vmem:[%s2159_s4 + $0x18] sm:$0xff] }
  0x10   :  { %v852_v43 = vld [vmem:[%s2159_s4 + $0x30] sm:$0xff]  ;;  %v853_v44 = vld [vmem:[%s2159_s4 + $0x38] sm:$0xff] }
  0x11   :  { %1497 = vmatpush3.bf16.msra.mxu0 %v1494_v22  ;;  %1525 = vmatpush3.bf16.msra.mxu1 %v1856_v28  ;;  %v1716_v45 = vpack.c.bf16 %v853_v44, %v852_v43  ;;  %v856_v49 = vld [vmem:[%s2159_s4 + $0x50] sm:$0xff] }
  0x12   :  { %1499 = vmatprep.subr.bf16.mxu0 %v1498_v29  ;;  %1526 = vmatprep.subr.bf16.mxu1 %v1747_v2 }
  0x15   :  { %1501 = vmatpush3.bf16.msra.mxu0 %v1498_v29  ;;  %1528 = vmatpush3.bf16.msra.mxu1 %v1872_v34 }
  0x16   :  { %1503 = vmatprep.subr.bf16.mxu0 %v1502_v35  ;;  %1529 = vmatprep.subr.bf16.mxu1 %v1747_v2 }
  0x19   :  { %1505 = vmatpush3.bf16.msra.mxu0 %v1502_v35  ;;  %1531 = vmatpush3.bf16.msra.mxu1 %v1888_v40  ;;  %v846_v35 = vld [vmem:[%s2159_s4] sm:$0xff] }
  0x1a   :  { %1507 = vmatprep.subr.bf16.mxu0 %v1506_v41  ;;  %1532 = vmatprep.subr.bf16.mxu1 %v1747_v2  ;;  %v1707_v38 = vpack.c.bf16 %v847_v36, %v846_v35 }
  0x1d   :  { %1509 = vmatpush3.bf16.msra.mxu0 %v1506_v41  ;;  %1534 = vmatpush3.bf16.msra.mxu1 %v1904_v46  ;;  %v851_v41 = vld [vmem:[%s2159_s4 + $0x28] sm:$0xff] }
  0x1e   :  { %1511 = vmatprep.subr.bf16.mxu0 %v1510_v47  ;;  %1535 = vmatprep.subr.bf16.mxu1 %v1747_v2 }
  0x21   :  { %1513 = vmatpush3.bf16.msra.mxu0 %v1510_v47  ;;  %1537 = vmatpush3.bf16.msra.mxu1 %v1914_v50  ;;  %v855_v47 = vld [vmem:[%s2159_s4 + $0x48] sm:$0xff] }
  0x22   :  { %1538 = vmatprep.subr.bf16.mxu0 %v1747_v2  ;;  %1562 = vmatprep.subr.bf16.mxu1 %v1747_v2 }
  0x24   :  { %1156 = vmatmul.mubr.f32.vlgmr.msra.gmra.mrb[0].mxu0 %v32_v51  ;;  %1200 = vmatmul.mubr.f32.vlgmr.msra.gmra.mrb[0].mxu1 %v1749_v4 }
  0x25   :  { %1540 = vmatpush3.bf16.msra.mxu0 %v1806_v9  ;;  %1564 = vmatpush3.bf16.msra.mxu1 %v1806_v9 }
  0x26   :  { %1541 = vmatprep.subr.bf16.mxu0 %v1747_v2  ;;  %1565 = vmatprep.subr.bf16.mxu1 %v1747_v2 }
  0x27   :  { %1269 = vmatprep.mubr.msk.f32.mxu1 %vm1748_vm0, %v1749_v4  ;;  %1158 = vmatprep.mubr.f32.mxu0 %v33_v52  ;;  %v858_v52 = vld [vmem:[%s2159_s4 + $0x60] sm:$0xff] }
  0x28   :  { %1159 = vmatmul.mubr.f32.gmra.mrb[2].mxu0 %v34_v53  ;;  %v859_v53 = vld [vmem:[%s2159_s4 + $0x68] sm:$0xff] }
  0x29   :  { %1543 = vmatpush3.bf16.msra.mxu0 %v1821_v15  ;;  %1567 = vmatpush3.bf16.msra.mxu1 %v1821_v15 }
  0x2a   :  { %1544 = vmatprep.subr.bf16.mxu0 %v1747_v2  ;;  %1568 = vmatprep.subr.bf16.mxu1 %v1747_v2 }
  0x2b   :  { %1161 = vmatprep.mubr.f32.mxu0 %v35_v54  ;;  %v1725_v54 = vpack.c.bf16 %v859_v53, %v858_v52 }
  0x2c   :  { %1162 = vmatmul.mubr.f32.gmra.mrb[4].mxu0 %v36_v55 }
  0x2d   :  { %1546 = vmatpush3.bf16.msra.mxu0 %v1837_v21  ;;  %1570 = vmatpush3.bf16.msra.mxu1 %v1837_v21 }
  0x2e   :  { %1547 = vmatprep.subr.bf16.mxu0 %v1747_v2  ;;  %1571 = vmatprep.subr.bf16.mxu1 %v1747_v2 }
  0x2f   :  { %1164 = vmatprep.mubr.f32.mxu0 %v37_v56 }
  0x30   :  { %1165 = vmatmul.mubr.f32.gmra.mrb[6].mxu0 %v38_v57 }
  0x31   :  { %1549 = vmatpush3.bf16.msra.mxu0 %v1856_v28  ;;  %1573 = vmatpush3.bf16.msra.mxu1 %v1856_v28 }
  0x32   :  { %1550 = vmatprep.subr.bf16.mxu0 %v1747_v2  ;;  %1574 = vmatprep.subr.bf16.mxu1 %v1747_v2 }
  0x33   :  { %1234 = vmatprep.mubr.msk.f32.mxu0 %vm1748_vm0, %v1749_v4 }
  0x35   :  { %1552 = vmatpush3.bf16.msra.mxu0 %v1872_v34  ;;  %1576 = vmatpush3.bf16.msra.mxu1 %v1872_v34 }
  0x36   :  { %1553 = vmatprep.subr.bf16.mxu0 %v1747_v2  ;;  %1577 = vmatprep.subr.bf16.mxu1 %v1747_v2 }
  0x39   :  { %1555 = vmatpush3.bf16.msra.mxu0 %v1888_v40  ;;  %1579 = vmatpush3.bf16.msra.mxu1 %v1888_v40 }
  0x3a   :  { %1556 = vmatprep.subr.bf16.mxu0 %v1747_v2  ;;  %1580 = vmatprep.subr.bf16.mxu1 %v1747_v2 }
  0x3d   :  { %1558 = vmatpush3.bf16.msra.mxu0 %v1904_v46  ;;  %1582 = vmatpush3.bf16.msra.mxu1 %v1904_v46 }
  0x3e   :  { %1559 = vmatprep.subr.bf16.mxu0 %v1747_v2  ;;  %1583 = vmatprep.subr.bf16.mxu1 %v1747_v2 }
  0x41   :  { %1561 = vmatpush3.bf16.msra.mxu0 %v1914_v50  ;;  %1585 = vmatpush3.bf16.msra.mxu1 %v1914_v50 }
  0x42   :  { %1586 = vmatprep.subr.bf16.mxu0 %v1747_v2  ;;  %1610 = vmatprep.subr.bf16.mxu1 %v1747_v2 }
  0xf7   :  { %v1157_v59 = vpop.f32.mrb[0].mxu0  ;;  %v263_v60 = vpop.f32.mrb[0].mxu1 }
  0xf8   :  { %v128_v61 = vpop.f32.mrb[1].mxu0  ;;  %v1201_v62 = vpop.f32.mrb[1].mxu1  ;;  %v134_v11 = vadd.f32 %v1157_v59, %v1981_v58 }
  0xf9   :  { %v129_v63 = vadd.f32 %v1981_v58, %v128_v61  ;;  %v860_v61 = vld [vmem:[%s2159_s4 + $0x70] sm:$0xff]  ;;  %v861_v62 = vld [vmem:[%s2159_s4 + $0x78] sm:$0xff] }
  0xfb   :  { %v267_v0 = vadd.f32 %v263_v60, %v129_v63  ;;  %v1160_v3 = vpop.f32.mrb[2].mxu0  ;;  %v1728_v63 = vpack.c.bf16 %v861_v62, %v860_v61 }
  0xfc   :  { %v138_v5 = vpop.f32.mrb[3].mxu0  ;;  %v144_v23 = vadd.f32 %v1160_v3, %v1981_v58 }
  0xfd   :  { %1733 = vtanh.f32 %v267_v0  ;;  %v139_v17 = vadd.f32 %v1981_v58, %v138_v5  ;;  %v945_v5 = vld [vmem:[%s2160_s5] ss:$0 sm:$0xff] }
  0xff   :  { %v2002_v6 = vpop.f32.mrb[4].mxu0 }
 0x100   :  { %v2004_v7 = vpop.f32.mrb[5].mxu0 }
 0x101   :  { %v149_v29 = vadd.f32 %v1981_v58, %v2004_v7 }
 0x103   :  { %v2006_v8 = vpop.f32.mrb[6].mxu0 }
 0x104   :  { %v2008_v10 = vpop.f32.mrb[7].mxu0 }
 0x105   :  { %v159_v55 = vadd.f32 %v1981_v58, %v2008_v10 }
 0x107   :  { %v1734_v1 = vpop.eup %1733 }
 0x108   :  { %1235 = vmatmul.mubr.f32.vlgmr.msra.gmra.mrb[8].mxu0 %v1734_v1 }
 0x109   :  { %1588 = vmatpush3.bf16.msra.mxu0 %v1806_v9  ;;  %1304 = vmatprep.mubr.msk.f32.mxu0 %vm1748_vm0, %v1749_v4 }
 0x10a   :  { %1589 = vmatprep.subr.bf16.mxu0 %v1747_v2 }
 0x10d   :  { %1591 = vmatpush3.bf16.msra.mxu0 %v1821_v15 }
 0x10e   :  { %1592 = vmatprep.subr.bf16.mxu0 %v1747_v2 }
 0x111   :  { %1594 = vmatpush3.bf16.msra.mxu0 %v1837_v21 }
 0x112   :  { %1595 = vmatprep.subr.bf16.mxu0 %v1747_v2 }
 0x115   :  { %1597 = vmatpush3.bf16.msra.mxu0 %v1856_v28 }
 0x116   :  { %1598 = vmatprep.subr.bf16.mxu0 %v1747_v2 }
 0x119   :  { %1600 = vmatpush3.bf16.msra.mxu0 %v1872_v34 }
 0x11a   :  { %1601 = vmatprep.subr.bf16.mxu0 %v1747_v2 }
 0x11d   :  { %1603 = vmatpush3.bf16.msra.mxu0 %v1888_v40 }
 0x11e   :  { %1604 = vmatprep.subr.bf16.mxu0 %v1747_v2 }
 0x121   :  { %1606 = vmatpush3.bf16.msra.mxu0 %v1904_v46 }
 0x122   :  { %1607 = vmatprep.subr.bf16.mxu0 %v1747_v2 }
 0x125   :  { %1609 = vmatpush3.bf16.msra.mxu0 %v1914_v50 }
 0x126   :  { %1634 = vmatprep.subr.bf16.mxu0 %v1747_v2 }
 0x1db   :  { %v344_v12 = vpop.f32.mrb[8].mxu0 }
 0x1dc   :  { %v348_v13 = vadd.f32 %v344_v12, %v134_v11  ;;  %v1236_v14 = vpop.f32.mrb[9].mxu0 }
 0x1de   :  { %1735 = vtanh.f32 %v348_v13 }
 0x1e8   :  { %v1736_v16 = vpop.eup %1735 }
 0x1e9   :  { %1270 = vmatmul.mubr.f32.vlgmr.msra.gmra.mrb[2].mxu1 %v1736_v16 }
 0x1ea   :  { %1612 = vmatpush3.bf16.msra.mxu1 %v1806_v9  ;;  %1339 = vmatprep.mubr.msk.f32.mxu1 %vm1748_vm0, %v1749_v4 }
 0x1eb   :  { %1613 = vmatprep.subr.bf16.mxu1 %v1747_v2 }
 0x1ee   :  { %1615 = vmatpush3.bf16.msra.mxu1 %v1821_v15 }
 0x1ef   :  { %1616 = vmatprep.subr.bf16.mxu1 %v1747_v2 }
 0x1f2   :  { %1618 = vmatpush3.bf16.msra.mxu1 %v1837_v21 }
 0x1f3   :  { %1619 = vmatprep.subr.bf16.mxu1 %v1747_v2 }
 0x1f6   :  { %1621 = vmatpush3.bf16.msra.mxu1 %v1856_v28 }
 0x1f7   :  { %1622 = vmatprep.subr.bf16.mxu1 %v1747_v2 }
 0x1fa   :  { %1624 = vmatpush3.bf16.msra.mxu1 %v1872_v34 }
 0x1fb   :  { %1625 = vmatprep.subr.bf16.mxu1 %v1747_v2 }
 0x1fe   :  { %1627 = vmatpush3.bf16.msra.mxu1 %v1888_v40 }
 0x1ff   :  { %1628 = vmatprep.subr.bf16.mxu1 %v1747_v2 }
 0x202   :  { %1630 = vmatpush3.bf16.msra.mxu1 %v1904_v46 }
 0x203   :  { %1631 = vmatprep.subr.bf16.mxu1 %v1747_v2 }
 0x206   :  { %1633 = vmatpush3.bf16.msra.mxu1 %v1914_v50 }
 0x207   :  { %1658 = vmatprep.subr.bf16.mxu1 %v1747_v2 }
 0x2bc   :  { %v425_v18 = vpop.f32.mrb[2].mxu1 }
 0x2bd   :  { %v429_v19 = vadd.f32 %v425_v18, %v139_v17  ;;  %v1271_v20 = vpop.f32.mrb[3].mxu1 }
 0x2bf   :  { %1737 = vtanh.f32 %v429_v19 }
 0x2c9   :  { %v1738_v22 = vpop.eup %1737 }
 0x2ca   :  { %1305 = vmatmul.mubr.f32.vlgmr.msra.gmra.mrb[10].mxu0 %v1738_v22 }
 0x2cb   :  { %1636 = vmatpush3.bf16.msra.mxu0 %v1806_v9  ;;  %1374 = vmatprep.mubr.msk.f32.mxu0 %vm1748_vm0, %v1749_v4 }
 0x2cc   :  { %1637 = vmatprep.subr.bf16.mxu0 %v1747_v2 }
 0x2cf   :  { %1639 = vmatpush3.bf16.msra.mxu0 %v1821_v15 }
 0x2d0   :  { %1640 = vmatprep.subr.bf16.mxu0 %v1747_v2 }
 0x2d3   :  { %1642 = vmatpush3.bf16.msra.mxu0 %v1837_v21 }
 0x2d4   :  { %1643 = vmatprep.subr.bf16.mxu0 %v1747_v2 }
 0x2d7   :  { %1645 = vmatpush3.bf16.msra.mxu0 %v1856_v28 }
 0x2d8   :  { %1646 = vmatprep.subr.bf16.mxu0 %v1747_v2 }
 0x2db   :  { %1648 = vmatpush3.bf16.msra.mxu0 %v1872_v34 }
 0x2dc   :  { %1649 = vmatprep.subr.bf16.mxu0 %v1747_v2 }
 0x2df   :  { %1651 = vmatpush3.bf16.msra.mxu0 %v1888_v40 }
 0x2e0   :  { %1652 = vmatprep.subr.bf16.mxu0 %v1747_v2 }
 0x2e3   :  { %1654 = vmatpush3.bf16.msra.mxu0 %v1904_v46 }
 0x2e4   :  { %1655 = vmatprep.subr.bf16.mxu0 %v1747_v2 }
 0x2e7   :  { %1657 = vmatpush3.bf16.msra.mxu0 %v1914_v50 }
 0x2e8   :  { %1682 = vmatprep.subr.bf16.mxu0 %v1747_v2 }
 0x39d   :  { %v506_v24 = vpop.f32.mrb[10].mxu0 }
 0x39e   :  { %v510_v25 = vadd.f32 %v506_v24, %v144_v23  ;;  %v1306_v26 = vpop.f32.mrb[11].mxu0 }
 0x3a0   :  { %1739 = vtanh.f32 %v510_v25 }
 0x3aa   :  { %v1740_v27 = vpop.eup %1739 }
 0x3ab   :  { %1340 = vmatmul.mubr.f32.vlgmr.msra.gmra.mrb[4].mxu1 %v1740_v27 }
 0x3ac   :  { %1660 = vmatpush3.bf16.msra.mxu1 %v1806_v9  ;;  %1409 = vmatprep.mubr.msk.f32.mxu1 %vm1748_vm0, %v1749_v4 }
 0x3ad   :  { %1661 = vmatprep.subr.bf16.mxu1 %v1747_v2 }
 0x3b0   :  { %1663 = vmatpush3.bf16.msra.mxu1 %v1821_v15 }
 0x3b1   :  { %1664 = vmatprep.subr.bf16.mxu1 %v1747_v2 }
 0x3b4   :  { %1666 = vmatpush3.bf16.msra.mxu1 %v1837_v21 }
 0x3b5   :  { %1667 = vmatprep.subr.bf16.mxu1 %v1747_v2 }
 0x3b8   :  { %1669 = vmatpush3.bf16.msra.mxu1 %v1856_v28 }
 0x3b9   :  { %1670 = vmatprep.subr.bf16.mxu1 %v1747_v2 }
 0x3bc   :  { %1672 = vmatpush3.bf16.msra.mxu1 %v1872_v34 }
 0x3bd   :  { %1673 = vmatprep.subr.bf16.mxu1 %v1747_v2 }
 0x3c0   :  { %1675 = vmatpush3.bf16.msra.mxu1 %v1888_v40 }
 0x3c1   :  { %1676 = vmatprep.subr.bf16.mxu1 %v1747_v2 }
 0x3c4   :  { %1678 = vmatpush3.bf16.msra.mxu1 %v1904_v46 }
 0x3c5   :  { %1679 = vmatprep.subr.bf16.mxu1 %v1747_v2 }
 0x3c8   :  { %1681 = vmatpush3.bf16.msra.mxu1 %v1914_v50 }
 0x3c9   :  { %1706 = vmatprep.subr.bf16.mxu1 %v1747_v2 }
 0x47e   :  { %v587_v30 = vpop.f32.mrb[4].mxu1 }
 0x47f   :  { %v591_v31 = vadd.f32 %v587_v30, %v149_v29  ;;  %v1341_v32 = vpop.f32.mrb[5].mxu1 }
 0x481   :  { %1741 = vtanh.f32 %v591_v31 }
 0x48b   :  { %v1742_v33 = vpop.eup %1741 }
 0x48c   :  { %1375 = vmatmul.mubr.f32.vlgmr.msra.gmra.mrb[12].mxu0 %v1742_v33 }
 0x48d   :  { %1684 = vmatpush3.bf16.msra.mxu0 %v1806_v9  ;;  %1444 = vmatprep.mubr.msk.f32.mxu0 %vm1748_vm0, %v1749_v4  ;;  %v154_v9 = vadd.f32 %v2002_v6, %v1981_v58 }
 0x48e   :  { %1685 = vmatprep.subr.bf16.mxu0 %v1747_v2 }
 0x491   :  { %1687 = vmatpush3.bf16.msra.mxu0 %v1821_v15 }
 0x492   :  { %1688 = vmatprep.subr.bf16.mxu0 %v1747_v2 }
 0x495   :  { %1690 = vmatpush3.bf16.msra.mxu0 %v1837_v21 }
 0x496   :  { %1691 = vmatprep.subr.bf16.mxu0 %v1747_v2 }
 0x499   :  { %1693 = vmatpush3.bf16.msra.mxu0 %v1856_v28 }
 0x49a   :  { %1694 = vmatprep.subr.bf16.mxu0 %v1747_v2 }
 0x49d   :  { %1696 = vmatpush3.bf16.msra.mxu0 %v1872_v34 }
 0x49e   :  { %1697 = vmatprep.subr.bf16.mxu0 %v1747_v2 }
 0x4a1   :  { %1699 = vmatpush3.bf16.msra.mxu0 %v1888_v40  ;;  %v1710_v40 = vpack.c.bf16 %v849_v39, %v848_v37 }
 0x4a2   :  { %1700 = vmatprep.subr.bf16.mxu0 %v1747_v2 }
 0x4a5   :  { %1702 = vmatpush3.bf16.msra.mxu0 %v1904_v46  ;;  %v854_v46 = vld [vmem:[%s2159_s4 + $0x40] sm:$0xff] }
 0x4a6   :  { %1703 = vmatprep.subr.bf16.mxu0 %v1747_v2  ;;  %v1719_v48 = vpack.c.bf16 %v855_v47, %v854_v46 }
 0x4a9   :  { %1705 = vmatpush3.bf16.msra.mxu0 %v1914_v50  ;;  %v857_v50 = vld [vmem:[%s2159_s4 + $0x58] sm:$0xff] }
 0x4aa   :  { %v1722_v51 = vpack.c.bf16 %v857_v50, %v856_v49 }
 0x55f   :  { %v668_v15 = vpop.f32.mrb[12].mxu0 }
 0x560   :  { %v672_v21 = vadd.f32 %v668_v15, %v154_v9  ;;  %v1376_v28 = vpop.f32.mrb[13].mxu0 }
 0x562   :  { %1743 = vtanh.f32 %v672_v21 }
 0x56c   :  { %v1744_v34 = vpop.eup %1743 }
 0x56d   :  { %1410 = vmatmul.mubr.f32.vlgmr.msra.gmra.mrb[6].mxu1 %v1744_v34 }
 0x56e   :  { %1479 = vmatprep.mubr.msk.f32.mxu1 %vm1748_vm0, %v1749_v4  ;;  %1708 = vmatpush3.bf16.msra.mxu1 %v1707_v38  ;;  %v850_v4 = vld [vmem:[%s2159_s4 + $0x20] sm:$0xff] }
 0x56f   :  { %1709 = vmatprep.subr.bf16.mxu1 %v1747_v2  ;;  %v1713_v42 = vpack.c.bf16 %v851_v41, %v850_v4 }
 0x572   :  { %1711 = vmatpush3.bf16.msra.mxu1 %v1710_v40 }
 0x573   :  { %1712 = vmatprep.subr.bf16.mxu1 %v1747_v2 }
 0x576   :  { %1714 = vmatpush3.bf16.msra.mxu1 %v1713_v42 }
 0x577   :  { %1715 = vmatprep.subr.bf16.mxu1 %v1747_v2 }
 0x57a   :  { %1717 = vmatpush3.bf16.msra.mxu1 %v1716_v45 }
 0x57b   :  { %1718 = vmatprep.subr.bf16.mxu1 %v1747_v2 }
 0x57e   :  { %1720 = vmatpush3.bf16.msra.mxu1 %v1719_v48 }
 0x57f   :  { %1721 = vmatprep.subr.bf16.mxu1 %v1747_v2 }
 0x582   :  { %1723 = vmatpush3.bf16.msra.mxu1 %v1722_v51 }
 0x583   :  { %1724 = vmatprep.subr.bf16.mxu1 %v1747_v2 }
 0x586   :  { %1726 = vmatpush3.bf16.msra.mxu1 %v1725_v54 }
 0x587   :  { %1727 = vmatprep.subr.bf16.mxu1 %v1747_v2  ;;  %v164_v2 = vadd.f32 %v2006_v8, %v1981_v58 }
 0x58a   :  { %1729 = vmatpush3.bf16.msra.mxu1 %v1728_v63 }
 0x640   :  { %v749_v56 = vpop.f32.mrb[6].mxu1 }
 0x641   :  { %v753_v57 = vadd.f32 %v749_v56, %v159_v55  ;;  %v1411_v59 = vpop.f32.mrb[7].mxu1 }
 0x643   :  { %1745 = vtanh.f32 %v753_v57 }
 0x64d   :  { %v1746_v60 = vpop.eup %1745 }
 0x64e   :  { %1445 = vmatmul.mubr.f32.vlgmr.msra.gmra.mrb[14].mxu0 %v1746_v60 }
 0x721   :  { %v830_v0 = vpop.f32.mrb[14].mxu0 }
 0x722   :  { %v834_v1 = vadd.f32 %v830_v0, %v164_v2  ;;  %v1446_v3 = vpop.f32.mrb[15].mxu0 }
 0x724   :  { %1480 = vmatmul.mubr.f32.vlgmr.msra.gmra.mrb[8].mxu1 %v834_v1 }
 0x7f7   :  { %v935_v6 = vpop.f32.mrb[8].mxu1 }
 0x7f8   :  { %v936_v7 = vadd.f32 %v945_v5, %v935_v6  ;;  %v1481_v10 = vpop.f32.mrb[9].mxu1 }
 0x7fa   :  { %939 = vst [vmem:[%s2161_s6] sm:$0xff] %v936_v7 }

</bundles_post_ra>
